<compile_context>
chip_gen: v6e
topology: v6e:2x2x1
jax: 0.10.0
libtpu: 0.0.40
codegen_flags: <defaults>
</compile_context>

<pallas_src>
import jax
import jax.numpy as jnp
from jax.experimental import pallas as pl
from jax.experimental.pallas import tpu as pltpu


def _round_up(x, m):
    return ((x + m - 1) // m) * m


def _cdiv(a, b):
    return (a + b - 1) // b


# ----------------------------------------------------------------------------- kernels


def _epilogue(h_f32, b1_ref, w2_ref, b2_ref, o_ref):
    # h_f32: (tm, Hp) f32 pre-activation of the dense layer.
    h = jnp.tanh(h_f32 + b1_ref[...].astype(jnp.float32))
    logits = jnp.dot(h.astype(w2_ref.dtype), w2_ref[...],
                     preferred_element_type=jnp.float32)
    o_ref[...] = (logits + b2_ref[...].astype(jnp.float32)).astype(o_ref.dtype)


def _head_kernel_fused(x_ref, w1_ref, b1_ref, w2_ref, b2_ref, o_ref):
    # x_ref:  (tm, H)   activation tile (stored dtype; cast to MXU dtype in-kernel)
    # w1_ref: (H, Hp)   dense weight (pre-transposed, resident, single-buffered)
    # b1_ref: (1, Hp)   dense bias (f32)
    # w2_ref: (Hp, Lp)  out_proj weight (resident)
    # b2_ref: (1, Lp)   out_proj bias (f32)
    # o_ref:  (tm, Lp)  lane-dense logits tile (f32)
    x = x_ref[...].astype(w1_ref.dtype)
    h = jnp.dot(x, w1_ref[...], preferred_element_type=jnp.float32)
    _epilogue(h, b1_ref, w2_ref, b2_ref, o_ref)


def _head_kernel_ktiled(x_ref, w1_ref, b1_ref, w2_ref, b2_ref, o_ref, h_acc):
    # Grid: (m tiles, k tiles).  k is the contraction dim of the first matmul;
    # accumulate in f32 scratch, run tanh + out_proj only on the last k step.
    k = pl.program_id(1)

    @pl.when(k == 0)
    def _():
        h_acc[...] = jnp.zeros_like(h_acc)

    x = x_ref[...].astype(w1_ref.dtype)
    h_acc[...] += jnp.dot(x, w1_ref[...], preferred_element_type=jnp.float32)

    @pl.when(k == pl.num_programs(1) - 1)
    def _():
        _epilogue(h_acc[...], b1_ref, w2_ref, b2_ref, o_ref)


# ----------------------------------------------------------------------------- wrapper


def prepare_head_params(w_dense, b_dense, w_out, b_out, *,
                        matmul_dtype=jnp.bfloat16):
    """Pad / cast the head parameters ONCE (hoist this out of the per-call path).

    Weights are stored pre-transposed as [in_features, out_features] so the kernel
    does plain row-major matmuls (y = x @ W + b), matching nn.Linear's x @ W.T + b.
    Zero padding cannot leak: padded b1 cols are 0 -> tanh(0) = 0, padded W2 rows are 0.
    """
    H = w_dense.shape[0]
    L = w_out.shape[1]
    Hp = _round_up(H, 128)
    Lp = _round_up(L, 128)
    w1 = jnp.pad(w_dense, ((0, 0), (0, Hp - H))).astype(matmul_dtype)      # (H, Hp)
    b1 = jnp.pad(b_dense.reshape(1, -1),
                 ((0, 0), (0, Hp - H))).astype(jnp.float32)                 # (1, Hp)
    w2 = jnp.pad(w_out, ((0, Hp - H), (0, Lp - L))).astype(matmul_dtype)    # (Hp, Lp)
    b2 = jnp.pad(b_out.reshape(1, -1),
                 ((0, 0), (0, Lp - L))).astype(jnp.float32)                 # (1, Lp)
    return w1, b1, w2, b2


def node_classification_head_prepared(features, w1, b1, w2, b2, *, num_labels,
                                      tm=1024, tk=None, out_dtype=jnp.float32):
    """features: [B, S, H]; prepared params from prepare_head_params.
    Returns logits [B, S, num_labels] in `out_dtype` (f32 by default)."""
    B, S, H = features.shape
    Hp = w1.shape[1]
    Lp = w2.shape[1]
    L = int(num_labels)
    N = B * S
    x2d = features.reshape(N, H)

    # ---- K-tile selection (contraction dim of the dense matmul) --------------------
    if tk is None:
        if H > 1024 and H % 128 == 0:
            # largest multiple of 128 that divides H and is <= 1024
            tk = max(t for t in range(128, 1025, 128) if H % t == 0)
        else:
            tk = H
    assert H % tk == 0, "tk must divide the hidden size"
    nk = H // tk

    # ---- token tile selection -------------------------------------------------------
    tm = _round_up(max(int(tm), 16), 16)
    tm = min(tm, _round_up(N, 16))
    # >= 2 parallel grid steps when possible so both v7x TensorCores stay busy.
    if _cdiv(N, tm) < 2 and N > 16:
        tm = max(16, _round_up(_cdiv(N, 2), 16))

    x_sz = jnp.dtype(features.dtype).itemsize
    w_sz = jnp.dtype(w1.dtype).itemsize
    o_sz = jnp.dtype(out_dtype).itemsize

    # Generation-aware VMEM cap (v7x: 64 MiB physical; v5e/v6e: 128 MiB).
    try:
        vmem_cap = int(pltpu.get_tpu_info().vmem_capacity_bytes)
    except Exception:
        vmem_cap = 64 << 20
    vmem_cap = int(vmem_cap * 0.85)

    def vmem_bytes(tm_):
        common = (Hp * 4 + Lp * 4                 # biases (f32, single-buffered)
                  + Hp * Lp * w_sz                # resident out_proj weight
                  + 2 * tm_ * Lp * o_sz           # double-buffered output tiles
                  + tm_ * Hp * 4 + tm_ * Lp * 4   # f32 h / logits intermediates
                  + tm_ * Hp * w_sz)              # in-kernel casts (x / h -> MXU dtype)
        if nk == 1:
            return common + 2 * tm_ * H * x_sz + H * Hp * w_sz
        return (common
                + 2 * tm_ * tk * x_sz             # double-buffered x tiles
                + 2 * tk * Hp * w_sz              # streamed W1 tiles
                + tm_ * Hp * 4)                   # f32 accumulator scratch

    # Shrink tm until the estimate (with headroom) fits the per-generation budget.
    while tm > 64 and int(vmem_bytes(tm) * 1.5) + (2 << 20) > vmem_cap:
        tm = max(64, _round_up(tm // 2, 16))
    nm = _cdiv(N, tm)
    vmem_limit = int(min(max(int(vmem_bytes(tm) * 1.5) + (2 << 20), 16 << 20), vmem_cap))

    resident = pl.Buffered(1)  # constant-index blocks: no double buffering needed

    if nk == 1:
        grid = (nm,)
        in_specs = [
            pl.BlockSpec((tm, H), lambda i: (i, 0)),                           # x (streamed)
            pl.BlockSpec((H, Hp), lambda i: (0, 0), pipeline_mode=resident),   # W1 resident
            pl.BlockSpec((1, Hp), lambda i: (0, 0), pipeline_mode=resident),   # b1
            pl.BlockSpec((Hp, Lp), lambda i: (0, 0), pipeline_mode=resident),  # W2 resident
            pl.BlockSpec((1, Lp), lambda i: (0, 0), pipeline_mode=resident),   # b2
        ]
        out_spec = pl.BlockSpec((tm, Lp), lambda i: (i, 0))
        kernel = _head_kernel_fused
        scratch = []
        dims = ("parallel",)
    else:
        grid = (nm, nk)
        in_specs = [
            pl.BlockSpec((tm, tk), lambda i, k: (i, k)),                          # x k-chunk
            pl.BlockSpec((tk, Hp), lambda i, k: (k, 0)),                          # W1 k-tile
            pl.BlockSpec((1, Hp), lambda i, k: (0, 0), pipeline_mode=resident),   # b1
            pl.BlockSpec((Hp, Lp), lambda i, k: (0, 0), pipeline_mode=resident),  # W2 resident
            pl.BlockSpec((1, Lp), lambda i, k: (0, 0), pipeline_mode=resident),   # b2
        ]
        out_spec = pl.BlockSpec((tm, Lp), lambda i, k: (i, 0))
        kernel = _head_kernel_ktiled
        scratch = [pltpu.VMEM((tm, Hp), jnp.float32)]
        dims = ("parallel", "arbitrary")

    out2d = pl.pallas_call(
        kernel,
        out_shape=jax.ShapeDtypeStruct((N, Lp), out_dtype),
        grid_spec=pltpu.PrefetchScalarGridSpec(
            num_scalar_prefetch=0,
            grid=grid,
            in_specs=in_specs,
            out_specs=out_spec,
            scratch_shapes=scratch,
        ),
        compiler_params=pltpu.CompilerParams(
            dimension_semantics=dims,
            vmem_limit_bytes=vmem_limit,
        ),
    )(x2d, w1, b1, w2, b2)

    return out2d[:, :L].reshape(B, S, L)


def node_classification_head(features, w_dense, b_dense, w_out, b_out, *,
                             tm=1024, tk=None, matmul_dtype=jnp.bfloat16,
                             out_dtype=jnp.float32):
    """Convenience wrapper that prepares the params per call.  For repeated calls,
    hoist prepare_head_params to model init and call node_classification_head_prepared."""
    L = w_out.shape[1]
    w1, b1, w2, b2 = prepare_head_params(w_dense, b_dense, w_out, b_out,
                                         matmul_dtype=matmul_dtype)
    return node_classification_head_prepared(features, w1, b1, w2, b2,
                                             num_labels=L, tm=tm, tk=tk,
                                             out_dtype=out_dtype)


def init_params(key, hidden_size, num_labels_node, dtype=jnp.float32):
    """Deterministic synthetic parameters (shapes match the PyTorch module)."""
    k1, k2, k3, k4 = jax.random.split(key, 4)
    scale1 = 1.0 / jnp.sqrt(hidden_size)
    # nn.Linear(hidden, hidden): weight (out=H, in=H) -> stored transposed (H, H)
    w_dense = (jax.random.uniform(k1, (hidden_size, hidden_size), dtype,
                                  minval=-1.0, maxval=1.0) * scale1)
    b_dense = (jax.random.uniform(k2, (1, hidden_size), dtype,
                                  minval=-1.0, maxval=1.0) * scale1)
    # nn.Linear(hidden, num_labels): weight (out=L, in=H) -> stored transposed (H, L)
    w_out = (jax.random.uniform(k3, (hidden_size, num_labels_node), dtype,
                                minval=-1.0, maxval=1.0) * scale1)
    b_out = (jax.random.uniform(k4, (1, num_labels_node), dtype,
                                minval=-1.0, maxval=1.0) * scale1)
    return w_dense, b_dense, w_out, b_out


if __name__ == "__main__":
    key = jax.random.PRNGKey(0)
    k_a, k_b, k_c, k_d = jax.random.split(key, 4)

    # --- Test 1: exact-precision path (f32 MXU operands), tight tolerance ------------
    B, S, H, L = 2, 8, 32, 5
    features = jax.random.normal(k_a, (B, S, H), dtype=jnp.float32)
    w_dense, b_dense, w_out, b_out = init_params(k_b, H, L)

    logits = node_classification_head(features, w_dense, b_dense, w_out, b_out,
                                      matmul_dtype=jnp.float32)
    logits = jax.block_until_ready(logits)

    ref = (jnp.tanh(features.reshape(-1, H) @ w_dense + b_dense) @ w_out + b_out)
    ref = ref.reshape(B, S, L)
    assert logits.shape == (B, S, L)
    assert jnp.allclose(logits, ref, atol=1e-5, rtol=1e-5), "f32 path mismatch"

    # --- Test 2: default bf16-operand path (f32 accumulation), loose tolerance -------
    logits_bf16 = jax.block_until_ready(
        node_classification_head(features, w_dense, b_dense, w_out, b_out))
    assert logits_bf16.shape == (B, S, L)
    assert jnp.allclose(logits_bf16, ref, atol=5e-2, rtol=5e-2), "bf16 path mismatch"

    # --- Test 3: K-tiled path (forced tk < H exercises the 2-D grid + accumulator) ---
    B2, S2, H2, L2 = 2, 16, 256, 10
    feats2 = jax.random.normal(k_c, (B2, S2, H2), dtype=jnp.float32)
    w_d2, b_d2, w_o2, b_o2 = init_params(k_d, H2, L2)
    logits2 = jax.block_until_ready(
        node_classification_head(feats2, w_d2, b_d2, w_o2, b_o2,
                                 tk=128, matmul_dtype=jnp.float32))
    ref2 = (jnp.tanh(feats2.reshape(-1, H2) @ w_d2 + b_d2) @ w_o2 + b_o2)
    ref2 = ref2.reshape(B2, S2, L2)
    assert logits2.shape == (B2, S2, L2)
    assert jnp.allclose(logits2, ref2, atol=1e-4, rtol=1e-4), "K-tiled path mismatch"

    # TODO(synk): training-mode dropout (hidden_dropout_prob) would need
    # pltpu.prng_seed + pltpu.prng_random_bits masking; omitted for eval semantics.
    print("KERNEL_OK")
</pallas_src>

<mosaic_0001>
module attributes {stable_mosaic.version = 11 : i64} {
  func.func @_head_kernel_fused(%arg0: i32, %arg1: memref<16x32xf32, #tpu.memory_space<vmem>>, %arg2: memref<32x128xf32, #tpu.memory_space<vmem>>, %arg3: memref<1x128xf32, #tpu.memory_space<vmem>>, %arg4: memref<128x128xf32, #tpu.memory_space<vmem>>, %arg5: memref<1x128xf32, #tpu.memory_space<vmem>>, %arg6: memref<16x128xf32, #tpu.memory_space<vmem>>) attributes {dimension_semantics = [#tpu.dimension_semantics<parallel>], iteration_bounds = array<i64: 1>, scalar_prefetch = 0 : i64, scratch_operands = 0 : i64, tpu.core_type = #tpu.core_type<tc>, window_params = [{transform_indices = @transform_0, window_bounds = array<i64: 16, 32>}, {pipeline_mode = #tpu.pipeline_mode<synchronous>, transform_indices = @transform_1, window_bounds = array<i64: 32, 128>}, {pipeline_mode = #tpu.pipeline_mode<synchronous>, transform_indices = @transform_2, window_bounds = array<i64: 1, 128>}, {pipeline_mode = #tpu.pipeline_mode<synchronous>, transform_indices = @transform_3, window_bounds = array<i64: 128, 128>}, {pipeline_mode = #tpu.pipeline_mode<synchronous>, transform_indices = @transform_4, window_bounds = array<i64: 1, 128>}, {transform_indices = @transform_5, window_bounds = array<i64: 16, 128>}]} {
    %c0 = arith.constant 0 : index
    %c0_0 = arith.constant 0 : index
    %0 = vector.load %arg1[%c0, %c0_0] : memref<16x32xf32, #tpu.memory_space<vmem>>, vector<16x32xf32>
    %c0_1 = arith.constant 0 : index
    %c0_2 = arith.constant 0 : index
    %1 = vector.load %arg2[%c0_1, %c0_2] : memref<32x128xf32, #tpu.memory_space<vmem>>, vector<32x128xf32>
    %cst = arith.constant dense<0.000000e+00> : vector<16x128xf32>
    %2 = tpu.matmul %0, %1, %cst {dimension_numbers = #tpu.dot_dimension_numbers<[1], [0], [0], [1], [0, 0, 1, 1], [], []>} : vector<16x32xf32>, vector<32x128xf32>, vector<16x128xf32> -> vector<16x128xf32>
    %c0_3 = arith.constant 0 : index
    %c0_4 = arith.constant 0 : index
    %3 = vector.load %arg3[%c0_3, %c0_4] : memref<1x128xf32, #tpu.memory_space<vmem>>, vector<1x128xf32>
    %4 = vector.broadcast %3 : vector<1x128xf32> to vector<16x128xf32>
    %5 = arith.addf %2, %4 : vector<16x128xf32>
    %6 = math.tanh %5 : vector<16x128xf32>
    %c0_5 = arith.constant 0 : index
    %c0_6 = arith.constant 0 : index
    %7 = vector.load %arg4[%c0_5, %c0_6] : memref<128x128xf32, #tpu.memory_space<vmem>>, vector<128x128xf32>
    %cst_7 = arith.constant dense<0.000000e+00> : vector<16x128xf32>
    %8 = tpu.matmul %6, %7, %cst_7 {dimension_numbers = #tpu.dot_dimension_numbers<[1], [0], [0], [1], [0, 0, 1, 1], [], []>} : vector<16x128xf32>, vector<128x128xf32>, vector<16x128xf32> -> vector<16x128xf32>
    %c0_8 = arith.constant 0 : index
    %c0_9 = arith.constant 0 : index
    %9 = vector.load %arg5[%c0_8, %c0_9] : memref<1x128xf32, #tpu.memory_space<vmem>>, vector<1x128xf32>
    %10 = vector.broadcast %9 : vector<1x128xf32> to vector<16x128xf32>
    %11 = arith.addf %8, %10 : vector<16x128xf32>
    %c0_10 = arith.constant 0 : index
    %c0_11 = arith.constant 0 : index
    %12 = vector.load %arg6[%c0_10, %c0_11] : memref<16x128xf32, #tpu.memory_space<vmem>>, vector<16x128xf32>
    tpu.vector_store %arg6[%c0_10, %c0_11], %11 {strides = array<i32>} : memref<16x128xf32, #tpu.memory_space<vmem>>, vector<16x128xf32>,
    return
  }
  func.func @transform_0(%arg0: i32) -> (i32, i32) {
    %c0_i32 = arith.constant 0 : i32
    %c0_i32_0 = arith.constant 0 : i32
    return %arg0, %c0_i32 : i32, i32
  }
  func.func @transform_1(%arg0: i32) -> (i32, i32) {
    %c0_i32 = arith.constant 0 : i32
    %c0_i32_0 = arith.constant 0 : i32
    %c0_i32_1 = arith.constant 0 : i32
    return %c0_i32, %c0_i32_0 : i32, i32
  }
  func.func @transform_2(%arg0: i32) -> (i32, i32) {
    %c0_i32 = arith.constant 0 : i32
    %c0_i32_0 = arith.constant 0 : i32
    %c0_i32_1 = arith.constant 0 : i32
    return %c0_i32, %c0_i32_0 : i32, i32
  }
  func.func @transform_3(%arg0: i32) -> (i32, i32) {
    %c0_i32 = arith.constant 0 : i32
    %c0_i32_0 = arith.constant 0 : i32
    %c0_i32_1 = arith.constant 0 : i32
    return %c0_i32, %c0_i32_0 : i32, i32
  }
  func.func @transform_4(%arg0: i32) -> (i32, i32) {
    %c0_i32 = arith.constant 0 : i32
    %c0_i32_0 = arith.constant 0 : i32
    %c0_i32_1 = arith.constant 0 : i32
    return %c0_i32, %c0_i32_0 : i32, i32
  }
  func.func @transform_5(%arg0: i32) -> (i32, i32) {
    %c0_i32 = arith.constant 0 : i32
    %c0_i32_0 = arith.constant 0 : i32
    return %arg0, %c0_i32 : i32, i32
  }
}

</mosaic_0001>

<bundles_post_ra>
// kernel: tpu_custom_call.1
= control target key start
LH: loop header
LB: loop body
LE: loop exit
PB: predicated region body
PF: predicated region fallthrough
CT: control target
= control target key end

     0   :  { %10 = vsyncpa [#allocation3], 0  ;;  %s515_s0 = inlined_call_operand.hbm [shape: f32[16,32], index: 0, kind: input, shape index: {}]   ;;  %s516_s1 = inlined_call_operand.hbm [shape: f32[32,128], index: 1, kind: input, shape index: {}]   ;;  %s517_s2 = inlined_call_operand.vmem [shape: f32[1,128], index: 2, kind: input, shape index: {}]   ;;  %s518_s3 = inlined_call_operand.hbm [shape: f32[128,128], index: 3, kind: input, shape index: {}]   ;;  %s519_s4 = inlined_call_operand.vmem [shape: f32[1,128], index: 4, kind: input, shape index: {}]   ;;  %s520_s5 = inlined_call_operand.hbm [shape: f32[16,128], index: 5, kind: output, shape index: {}]  }
   0x1   :  { %11 = vsyncpa [#allocation6], 0 }
   0x2   :  { %12 = vsyncpa [#allocation4], 0  ;;  %s447_s18 = smov [#allocation5]   ;;  %s448_s20 = smov [#allocation2]  }
   0x3   :  { %s30_s19 = sshll.u32 %s447_s18, 4  ;;  %s18_s21 = sshll.u32 %s448_s20, 4  ;;  %s31_s19 = int_to_ptr.vmem [resolvable:$true] %s30_s19  ;;  %s19_s21 = int_to_ptr.vmem [resolvable:$true] %s18_s21 }
   0x4   :  { %s369_s22 = scalar_lea.vmem %s31_s19, 512  ;;  %p374_p1 = scmp.lt.s32.totalorder %s31_s19, %s31_s19 }
   0x5   :  { %p370_p0 = scmp.ne.s32.totalorder %s31_s19, %s369_s22  ;;  %p375_p2 = scmp.lt.s32.totalorder %s369_s22, %s369_s22 }
   0x7   :  { %p376_p3 = por %p375_p2, %p374_p1 }
   0x9   :  { %p377_p4 = pnand %p376_p3, %p370_p0 }
   0xb   :  { %380 = shalt.err (!%p377_p4)
}
   0xc   :  { %s449_s23 = smov 128   ;;  %s450_s24 = smov 8  }
   0xd   :  { %36 = dma.hbm_to_vmem [thread:$0]  %s516_s1, 512, %s31_s19, [#allocation6], %s449_s23, %s449_s23, %s450_s24  }
   0xe   :  { %s389_s27 = scalar_lea.vmem %s19_s21, 256  ;;  %p394_p6 = scmp.lt.s32.totalorder %s19_s21, %s19_s21 }
   0xf   :  { %p390_p5 = scmp.ne.s32.totalorder %s19_s21, %s389_s27  ;;  %p395_p7 = scmp.lt.s32.totalorder %s389_s27, %s389_s27 }
  0x11   :  { %p396_p8 = por %p395_p7, %p394_p6 }
  0x13   :  { %p397_p9 = pnand %p396_p8, %p390_p5 }
  0x15   :  { %400 = shalt.err (!%p397_p9)
}
  0x16   :  { %24 = dma.hbm_to_vmem [thread:$0]  %s515_s0, 256, %s19_s21, [#allocation3], %s449_s23, %s449_s23, %s450_s24  }
  0x17   :  { %s451_s30 = smov [#allocation7]  }
  0x18   :  { %s44_s6 = sshll.u32 %s451_s30, 4  ;;  %s45_s6 = int_to_ptr.vmem [resolvable:$true] %s44_s6 }
  0x19   :  { %s409_s7 = scalar_lea.vmem %s45_s6, 2048  ;;  %p414_p11 = scmp.lt.s32.totalorder %s45_s6, %s45_s6 }
  0x1a   :  { %p410_p10 = scmp.ne.s32.totalorder %s45_s6, %s409_s7  ;;  %p415_p12 = scmp.lt.s32.totalorder %s409_s7, %s409_s7 }
  0x1c   :  { %p416_p13 = por %p415_p12, %p414_p11 }
  0x1e   :  { %p417_p0 = pnand %p416_p13, %p410_p10 }
  0x20   :  { %420 = shalt.err (!%p417_p0)
}
  0x21   :  { %50 = dma.hbm_to_vmem [thread:$0]  %s518_s3, 2048, %s45_s6, [#allocation6], %s449_s23, %s449_s23, %s450_s24  }
  0x22   :  { %441 = dma.done.wait [#allocation3], 256  }
  0x23   :  { %442 = vsyncadd [#allocation3], 4294967040 }
  0x24   :  { %443 = dma.done.wait [#allocation6], 2560  }
  0x25   :  { %444 = vsyncadd [#allocation6], 4294964736  ;;  %vm75_vm0 = vcmask 261120   ;;  %v67_v0 = vld [vmem:[#allocation5 + $0x18] sm:$0xff]  ;;  %v66_v1 = vld [vmem:[#allocation5 + $0x10] sm:$0xff]  ;;  %s452_s11 = smov [#allocation8]  }
  0x26   :  { %305 = vmatprep.subr.mxu0 %v67_v0  ;;  %v62_v2 = vld [vmem:[#allocation2] sm:$0xff]  ;;  %v65_v3 = vld [vmem:[#allocation5 + $0x8] sm:$0xff]  ;;  %v174_v4 = vld [vmem:[#allocation7 + $0x78] sm:$0xff]  ;;  %s264_s12 = sshll.u32 %s452_s11, 4  ;;  %s265_s12 = int_to_ptr.vmem [resolvable:$true] %s264_s12 }
  0x27   :  { %306 = vmatpush3.msra.mxu0 %v67_v0  ;;  %313 = vmatprep.mubr.msk.f32.mxu0 %vm75_vm0, %v62_v2  ;;  %v173_v5 = vld [vmem:[#allocation7 + $0x70] sm:$0xff]  ;;  %v64_v6 = vld [vmem:[#allocation5] sm:$0xff]  ;;  %v172_v7 = vld [vmem:[#allocation7 + $0x68] sm:$0xff]  ;;  %p426_p2 = scmp.lt.s32.totalorder %s265_s12, %s265_s12 }
  0x28   :  { %307 = vmatprep.subr.mxu0 %v66_v1  ;;  %316 = vmatprep.subr.mxu1 %v174_v4  ;;  %v63_v8 = vld [vmem:[#allocation2 + $0x8] sm:$0xff]  ;;  %v171_v9 = vld [vmem:[#allocation7 + $0x60] sm:$0xff]  ;;  %v169_v11 = vld [vmem:[#allocation7 + $0x50] sm:$0xff] }
  0x29   :  { %308 = vmatpush3.msra.mxu0 %v66_v1  ;;  %317 = vmatpush3.msra.mxu1 %v174_v4  ;;  %v170_v10 = vld [vmem:[#allocation7 + $0x58] sm:$0xff]  ;;  %v168_v12 = vld [vmem:[#allocation7 + $0x48] sm:$0xff]  ;;  %v167_v13 = vld [vmem:[#allocation7 + $0x40] sm:$0xff] }
  0x2a   :  { %309 = vmatprep.subr.mxu0 %v65_v3  ;;  %318 = vmatprep.subr.mxu1 %v173_v5  ;;  %v166_v14 = vld [vmem:[#allocation7 + $0x38] sm:$0xff]  ;;  %v165_v15 = vld [vmem:[#allocation7 + $0x30] sm:$0xff]  ;;  %v164_v16 = vld [vmem:[#allocation7 + $0x28] sm:$0xff] }
  0x2b   :  { %310 = vmatpush3.msra.mxu0 %v65_v3  ;;  %319 = vmatpush3.msra.mxu1 %v173_v5  ;;  %v163_v17 = vld [vmem:[#allocation7 + $0x20] sm:$0xff]  ;;  %v162_v18 = vld [vmem:[#allocation7 + $0x18] sm:$0xff]  ;;  %v161_v19 = vld [vmem:[#allocation7 + $0x10] sm:$0xff] }
  0x2c   :  { %311 = vmatprep.subr.mxu0 %v64_v6  ;;  %320 = vmatprep.subr.mxu1 %v172_v7  ;;  %v160_v20 = vld [vmem:[#allocation7 + $0x8] sm:$0xff]  ;;  %v159_v21 = vld [vmem:[#allocation7] sm:$0xff]  ;;  %v277_v22 = vld [vmem:[%s517_s2] ss:$0 sm:$0xff]  ;;  %s421_s2 = scalar_lea.vmem %s265_s12, 256 }
  0x2d   :  { %312 = vmatpush3.msra.mxu0 %v64_v6  ;;  %321 = vmatpush3.msra.mxu1 %v172_v7  ;;  %v280_v29 = vld [vmem:[%s519_s4] ss:$0 sm:$0xff]  ;;  %p422_p1 = scmp.ne.s32.totalorder %s265_s12, %s421_s2  ;;  %p427_p3 = scmp.lt.s32.totalorder %s421_s2, %s421_s2 }
  0x2e   :  { %314 = vmatmul.mubr.msk.f32.vlgmr.msra.gmra.mxu0 %vm75_vm0, %v63_v8  ;;  %322 = vmatprep.subr.mxu1 %v171_v9 }
  0x2f   :  { %323 = vmatpush3.msra.mxu1 %v171_v9  ;;  %p428_p4 = por %p427_p3, %p426_p2 }
  0x30   :  { %324 = vmatprep.subr.mxu1 %v170_v10 }
  0x31   :  { %325 = vmatpush3.msra.mxu1 %v170_v10  ;;  %p429_p5 = pnand %p428_p4, %p422_p1 }
  0x32   :  { %326 = vmatprep.subr.mxu1 %v169_v11 }
  0x33   :  { %327 = vmatpush3.msra.mxu1 %v169_v11 }
  0x34   :  { %328 = vmatprep.subr.mxu1 %v168_v12 }
  0x35   :  { %329 = vmatpush3.msra.mxu1 %v168_v12 }
  0x36   :  { %330 = vmatprep.subr.mxu1 %v167_v13 }
  0x37   :  { %331 = vmatpush3.msra.mxu1 %v167_v13 }
  0x38   :  { %332 = vmatprep.subr.mxu1 %v166_v14 }
  0x39   :  { %333 = vmatpush3.msra.mxu1 %v166_v14 }
  0x3a   :  { %334 = vmatprep.subr.mxu1 %v165_v15 }
  0x3b   :  { %335 = vmatpush3.msra.mxu1 %v165_v15 }
  0x3c   :  { %336 = vmatprep.subr.mxu1 %v164_v16 }
  0x3d   :  { %337 = vmatpush3.msra.mxu1 %v164_v16 }
  0x3e   :  { %338 = vmatprep.subr.mxu1 %v163_v17 }
  0x3f   :  { %339 = vmatpush3.msra.mxu1 %v163_v17 }
  0x40   :  { %340 = vmatprep.subr.mxu1 %v162_v18 }
  0x41   :  { %341 = vmatpush3.msra.mxu1 %v162_v18 }
  0x42   :  { %342 = vmatprep.subr.mxu1 %v161_v19 }
  0x43   :  { %343 = vmatpush3.msra.mxu1 %v161_v19 }
  0x44   :  { %344 = vmatprep.subr.mxu1 %v160_v20 }
  0x45   :  { %345 = vmatpush3.msra.mxu1 %v160_v20 }
  0x46   :  { %346 = vmatprep.subr.mxu1 %v159_v21 }
  0x47   :  { %347 = vmatpush3.msra.mxu1 %v159_v21 }
  0xee   :  { %v315_v23 = vpop.f32.mrf.mxu0 }
  0xef   :  { %v154_v24 = vadd.f32 %v315_v23, %v277_v22 }
  0xf0   :  { %v148_v25 = vpop.f32.mrf.mxu0 }
  0xf1   :  { %v149_v26 = vadd.f32 %v277_v22, %v148_v25 }
  0xf3   :  { %357 = vtanh.f32 %v149_v26 }
  0xf4   :  { %359 = vtanh.f32 %v154_v24 }
 0x100   :  { %v358_v27 = vpop.eup %357 }
 0x101   :  { %v360_v28 = vpop.eup %359  ;;  %348 = vmatprep.mubr.f32.mxu1 %v358_v27 }
 0x102   :  { %349 = vmatmul.mubr.f32.vlgmr.msra.gmra.mxu1 %v360_v28 }
 0x1c2   :  { %v350_v30 = vpop.f32.mrf.mxu1 }
 0x1c3   :  { %v254_v31 = vadd.f32 %v350_v30, %v280_v29 }
 0x1c4   :  { %v248_v32 = vpop.f32.mrf.mxu1 }
 0x1c5   :  { %258 = vst [vmem:[#allocation8 + $0x8] sm:$0xff] %v254_v31  ;;  %v249_v33 = vadd.f32 %v280_v29, %v248_v32 }
 0x1c7   :  { %257 = vst [vmem:[#allocation8] sm:$0xff] %v249_v33 }
 0x1c8   :  { %432 = shalt.err (!%p429_p5)
}
 0x1c9   :  { %270 = dma.vmem_to_hbm [thread:$0]  %s265_s12, 256, %s520_s5, [#allocation4], %s449_s23, %s449_s23, %s450_s24  }
 0x1ca   :  { %445 = dma.done.wait [#allocation4], 256  }
 0x1cb   :  { %446 = vsyncadd [#allocation4], 4294967040 }
 0x1cc   :  { %274 = vsyncpa [#allocation3], 1 }
 0x1cd   :  { %275 = vsyncpa [#allocation6], 1 }
 0x1ce   :  { %276 = vsyncpa [#allocation4], 1 }

</bundles_post_ra>
